<compile_context>
chip_gen: v7x
topology: tpu7x:2x2x1
jax: 0.10.0
libtpu: 0.0.40
codegen_flags: <defaults>
</compile_context>

<pallas_src>
from functools import partial

import jax
import jax.numpy as jnp
from jax.experimental import pallas as pl
from jax.experimental.pallas import tpu as pltpu


def _round_up(x, m):
    return (x + m - 1) // m * m


def _vmem_capacity_bytes():
    """Per-TensorCore VMEM capacity; conservative fallback if query fails."""
    try:
        info = pltpu.get_tpu_info()
        cap = getattr(info, "vmem_capacity_bytes", None)
        if cap:
            return int(cap)
    except Exception:
        pass
    return 64 * 1024 * 1024  # safe default (v7x per-TC size)


def _ff_kernel_resident(x_ref, w1_ref, b1_ref, w2_ref, b2_ref, o_ref, *,
                        approximate):
    """Whole MLP for one (tm, Dp) token tile; weights fully resident in VMEM."""
    h = jnp.dot(x_ref[...], w1_ref[...], preferred_element_type=jnp.float32)
    h = jax.nn.gelu(h + b1_ref[...].astype(jnp.float32), approximate=approximate)
    y = jnp.dot(h.astype(w2_ref.dtype), w2_ref[...],
                preferred_element_type=jnp.float32)
    o_ref[...] = (y + b2_ref[...].astype(jnp.float32)).astype(o_ref.dtype)


def _ff_kernel_stream(x_ref, w1_ref, b1_ref, w2_ref, b2_ref, o_ref, acc_ref, *,
                      approximate):
    """One (tm, Dp) token tile x one th hidden slab; accumulate over slabs."""
    k = pl.program_id(1)

    @pl.when(k == 0)
    def _init():
        acc_ref[...] = jnp.zeros_like(acc_ref)

    h = jnp.dot(x_ref[...], w1_ref[...], preferred_element_type=jnp.float32)
    h = jax.nn.gelu(h + b1_ref[...].astype(jnp.float32), approximate=approximate)
    acc_ref[...] += jnp.dot(h.astype(w2_ref.dtype), w2_ref[...],
                            preferred_element_type=jnp.float32)

    @pl.when(k == pl.num_programs(1) - 1)
    def _finalize():
        o_ref[...] = (acc_ref[...] + b2_ref[...].astype(jnp.float32)
                      ).astype(o_ref.dtype)


def feed_forward(x2d, w1, b1, w2, b2, *,
                 compute_dtype=jnp.bfloat16,
                 exact_gelu=False,
                 tm=None, th=None,
                 vmem_limit_bytes=None,
                 resident_weight_budget=None):
    """x2d: (M, D) tokens-by-features.  Returns gelu(x@w1+b1)@w2 + b2."""
    M, D = x2d.shape
    Dw, H = w1.shape
    assert Dw == D and w2.shape == (H, D) and b1.shape == (H,) and b2.shape == (D,)

    out_dtype = x2d.dtype
    c_size = jnp.dtype(compute_dtype).itemsize
    o_size = jnp.dtype(out_dtype).itemsize

    # ---- Generation-aware budgets --------------------------------------
    cap = _vmem_capacity_bytes()
    big_vmem = cap >= 120 * 1024 * 1024          # v5e / v6e (128 MiB); v7x is 64 MiB
    if vmem_limit_bytes is None:
        vmem_limit_bytes = (100 if big_vmem else 52) * 1024 * 1024
    if resident_weight_budget is None:
        resident_weight_budget = (64 if big_vmem else 24) * 1024 * 1024

    # ---- Lane-dense feature dims (multiple of 128) ----------------------
    Dp = _round_up(D, 128)
    Hp = _round_up(H, 128)

    # ---- Hidden (reduction) tiling: resident weights when they fit ------
    wbytes = 2 * Dp * Hp * c_size                # W1 + W2 in compute dtype
    if th is None:
        th = Hp if wbytes <= resident_weight_budget else 512
    th = min(_round_up(th, 128), Hp)
    Hp = _round_up(Hp, th)
    n_h = Hp // th
    resident = n_h == 1

    # ---- Token tile: dtype-aware, roofline-sized, megacore-splittable ---
    sub = max(8, 32 // c_size)                   # 8 (f32), 16 (bf16), 32 (8-bit)
    if tm is None:
        # Streaming weights on 128 MiB parts needs ~1024 rows to be MXU-bound.
        tm = 512 if (resident or not big_vmem) else 1024
    tm = max(sub, min(_round_up(tm, sub), _round_up(M, sub)))
    if M >= 2 * sub:                             # >= 2 token blocks so the
        tm = min(tm, _round_up(-(-M // 2), sub))  # "parallel" axis shards TCs

    # Auto-shrink tm if the token-tile buffers would blow the VMEM budget.
    n_wbuf = 1 if resident else (3 if big_vmem else 2)
    w_vmem = n_wbuf * 2 * Dp * th * c_size + (Hp + Dp) * 4

    def _tile_bytes(t):
        return (2 * t * Dp * c_size + 2 * t * Dp * o_size
                + (0 if resident else t * Dp * 4))

    while tm > sub and _tile_bytes(tm) + w_vmem > int(0.85 * vmem_limit_bytes):
        tm = max(sub, _round_up(tm // 2, sub))
    # TODO(synk): for extremely large D even tm == sub may not fit v7x VMEM;
    # that would need an extra K-tile over Dp for the first matmul.

    Mp = _round_up(M, tm)
    n_m = Mp // tm

    # ---- Zero-pad (zeros are inert through both matmuls) ----------------
    xp = jnp.pad(x2d.astype(compute_dtype), ((0, Mp - M), (0, Dp - D)))
    w1p = jnp.pad(w1.astype(compute_dtype), ((0, Dp - D), (0, Hp - H)))
    b1p = jnp.pad(b1.astype(jnp.float32).reshape(1, -1), ((0, 0), (0, Hp - H)))
    w2p = jnp.pad(w2.astype(compute_dtype), ((0, Hp - H), (0, Dp - D)))
    b2p = jnp.pad(b2.astype(jnp.float32).reshape(1, -1), ((0, 0), (0, Dp - D)))

    approximate = not exact_gelu

    # ---- Cost estimate (streamed weights counted once per token block) --
    w_reps = 1 if resident else n_m
    cost = pl.CostEstimate(
        flops=4 * Mp * Dp * Hp,                  # two matmuls, 2*M*N*K each
        transcendentals=Mp * Hp,                 # one transcendental per GELU
        bytes_accessed=(Mp * Dp * c_size         # x in
                        + Mp * Dp * o_size       # out
                        + w_reps * 2 * Dp * Hp * c_size
                        + (Hp + Dp) * 4),        # biases (f32)
    )

    if resident:
        one = pl.Buffered(1)                     # constant blocks: single-buffer
        grid_spec = pltpu.PrefetchScalarGridSpec(
            num_scalar_prefetch=0,
            grid=(n_m,),
            in_specs=[
                pl.BlockSpec((tm, Dp), lambda i: (i, 0)),                       # x
                pl.BlockSpec((Dp, Hp), lambda i: (0, 0), pipeline_mode=one),    # w1
                pl.BlockSpec((1, Hp), lambda i: (0, 0), pipeline_mode=one),     # b1
                pl.BlockSpec((Hp, Dp), lambda i: (0, 0), pipeline_mode=one),    # w2
                pl.BlockSpec((1, Dp), lambda i: (0, 0), pipeline_mode=one),     # b2
            ],
            out_specs=pl.BlockSpec((tm, Dp), lambda i: (i, 0)),
            scratch_shapes=[],
        )
        kernel = partial(_ff_kernel_resident, approximate=approximate)
        dims = ("parallel",)
    else:
        wmode = pl.Buffered(n_wbuf)
        grid_spec = pltpu.PrefetchScalarGridSpec(
            num_scalar_prefetch=0,
            grid=(n_m, n_h),
            in_specs=[
                pl.BlockSpec((tm, Dp), lambda i, k: (i, 0)),                        # x
                pl.BlockSpec((Dp, th), lambda i, k: (0, k), pipeline_mode=wmode),   # w1
                pl.BlockSpec((1, th), lambda i, k: (0, k), pipeline_mode=wmode),    # b1
                pl.BlockSpec((th, Dp), lambda i, k: (k, 0), pipeline_mode=wmode),   # w2
                pl.BlockSpec((1, Dp), lambda i, k: (0, 0),
                             pipeline_mode=pl.Buffered(1)),                          # b2
            ],
            out_specs=pl.BlockSpec((tm, Dp), lambda i, k: (i, 0)),
            scratch_shapes=[pltpu.VMEM((tm, Dp), jnp.float32)],
        )
        kernel = partial(_ff_kernel_stream, approximate=approximate)
        dims = ("parallel", "arbitrary")

    out = pl.pallas_call(
        kernel,
        out_shape=jax.ShapeDtypeStruct((Mp, Dp), out_dtype),
        grid_spec=grid_spec,
        compiler_params=pltpu.CompilerParams(
            dimension_semantics=dims,
            vmem_limit_bytes=int(vmem_limit_bytes)),
        cost_estimate=cost,
    )(xp, w1p, b1p, w2p, b2p)

    return out[:M, :D]


if __name__ == "__main__":
    batch, seq, dim, hidden = 2, 8, 32, 64

    key = jax.random.PRNGKey(0)
    kx, k1, k2, k3, k4 = jax.random.split(key, 5)

    x = jax.random.normal(kx, (batch, seq, dim), dtype=jnp.float32)

    # Deterministic synthetic parameters (nn.Linear weights as (in, out)).
    w1 = jax.random.normal(k1, (dim, hidden), dtype=jnp.float32) * 0.05
    b1 = jax.random.normal(k2, (hidden,), dtype=jnp.float32) * 0.01
    w2 = jax.random.normal(k3, (hidden, dim), dtype=jnp.float32) * 0.05
    b2 = jax.random.normal(k4, (dim,), dtype=jnp.float32) * 0.01

    x2d = x.reshape(batch * seq, dim)
    out = feed_forward(x2d, w1, b1, w2, b2).reshape(batch, seq, dim)
    jax.block_until_ready(out)

    # Reference forward pass (dropout p=0 is identity).  Kernel runs bf16
    # matmuls with f32 accumulation, so compare with a loose tolerance
    # against the f32 reference.
    ref = (jax.nn.gelu(x2d @ w1 + b1, approximate=True) @ w2 + b2)
    ref = ref.reshape(batch, seq, dim)
    assert jnp.allclose(out, ref, atol=2e-2, rtol=2e-2), "mismatch vs reference"

    print("KERNEL_OK")
</pallas_src>

<mosaic_0001>
module attributes {stable_mosaic.version = 11 : i64} {
  func.func @_ff_kernel_resident(%arg0: i32, %arg1: memref<16x128xbf16, #tpu.memory_space<vmem>>, %arg2: memref<128x128xbf16, #tpu.memory_space<vmem>>, %arg3: memref<1x128xf32, #tpu.memory_space<vmem>>, %arg4: memref<128x128xbf16, #tpu.memory_space<vmem>>, %arg5: memref<1x128xf32, #tpu.memory_space<vmem>>, %arg6: memref<16x128xf32, #tpu.memory_space<vmem>>) attributes {dimension_semantics = [#tpu.dimension_semantics<parallel>], iteration_bounds = array<i64: 1>, scalar_prefetch = 0 : i64, scratch_operands = 0 : i64, tpu.core_type = #tpu.core_type<tc>, window_params = [{transform_indices = @transform_0, window_bounds = array<i64: 16, 128>}, {pipeline_mode = #tpu.pipeline_mode<synchronous>, transform_indices = @transform_1, window_bounds = array<i64: 128, 128>}, {pipeline_mode = #tpu.pipeline_mode<synchronous>, transform_indices = @transform_2, window_bounds = array<i64: 1, 128>}, {pipeline_mode = #tpu.pipeline_mode<synchronous>, transform_indices = @transform_3, window_bounds = array<i64: 128, 128>}, {pipeline_mode = #tpu.pipeline_mode<synchronous>, transform_indices = @transform_4, window_bounds = array<i64: 1, 128>}, {transform_indices = @transform_5, window_bounds = array<i64: 16, 128>}]} {
    %c0 = arith.constant 0 : index
    %c0_0 = arith.constant 0 : index
    %0 = vector.load %arg1[%c0, %c0_0] : memref<16x128xbf16, #tpu.memory_space<vmem>>, vector<16x128xbf16>
    %c0_1 = arith.constant 0 : index
    %c0_2 = arith.constant 0 : index
    %1 = vector.load %arg2[%c0_1, %c0_2] : memref<128x128xbf16, #tpu.memory_space<vmem>>, vector<128x128xbf16>
    %cst = arith.constant dense<0.000000e+00> : vector<16x128xf32>
    %2 = tpu.matmul %0, %1, %cst {dimension_numbers = #tpu.dot_dimension_numbers<[1], [0], [0], [1], [0, 0, 1, 1], [], []>} : vector<16x128xbf16>, vector<128x128xbf16>, vector<16x128xf32> -> vector<16x128xf32>
    %c0_3 = arith.constant 0 : index
    %c0_4 = arith.constant 0 : index
    %3 = vector.load %arg3[%c0_3, %c0_4] : memref<1x128xf32, #tpu.memory_space<vmem>>, vector<1x128xf32>
    %4 = vector.broadcast %3 : vector<1x128xf32> to vector<16x128xf32>
    %5 = arith.addf %2, %4 : vector<16x128xf32>
    %6 = arith.mulf %5, %5 : vector<16x128xf32>
    %7 = arith.mulf %5, %6 : vector<16x128xf32>
    %cst_5 = arith.constant 4.471500e-02 : f32
    %8 = vector.broadcast %cst_5 : f32 to vector<16x128xf32>
    %9 = arith.mulf %8, %7 : vector<16x128xf32>
    %10 = arith.addf %5, %9 : vector<16x128xf32>
    %cst_6 = arith.constant 0.797884583 : f32
    %11 = vector.broadcast %cst_6 : f32 to vector<16x128xf32>
    %12 = arith.mulf %11, %10 : vector<16x128xf32>
    %13 = math.tanh %12 : vector<16x128xf32>
    %cst_7 = arith.constant 1.000000e+00 : f32
    %14 = vector.broadcast %cst_7 : f32 to vector<16x128xf32>
    %15 = arith.addf %14, %13 : vector<16x128xf32>
    %cst_8 = arith.constant 5.000000e-01 : f32
    %16 = vector.broadcast %cst_8 : f32 to vector<16x128xf32>
    %17 = arith.mulf %16, %15 : vector<16x128xf32>
    %18 = arith.mulf %5, %17 : vector<16x128xf32>
    %19 = arith.truncf %18 : vector<16x128xf32> to vector<16x128xbf16>
    %c0_9 = arith.constant 0 : index
    %c0_10 = arith.constant 0 : index
    %20 = vector.load %arg4[%c0_9, %c0_10] : memref<128x128xbf16, #tpu.memory_space<vmem>>, vector<128x128xbf16>
    %cst_11 = arith.constant dense<0.000000e+00> : vector<16x128xf32>
    %21 = tpu.matmul %19, %20, %cst_11 {dimension_numbers = #tpu.dot_dimension_numbers<[1], [0], [0], [1], [0, 0, 1, 1], [], []>} : vector<16x128xbf16>, vector<128x128xbf16>, vector<16x128xf32> -> vector<16x128xf32>
    %c0_12 = arith.constant 0 : index
    %c0_13 = arith.constant 0 : index
    %22 = vector.load %arg5[%c0_12, %c0_13] : memref<1x128xf32, #tpu.memory_space<vmem>>, vector<1x128xf32>
    %23 = vector.broadcast %22 : vector<1x128xf32> to vector<16x128xf32>
    %24 = arith.addf %21, %23 : vector<16x128xf32>
    %c0_14 = arith.constant 0 : index
    %c0_15 = arith.constant 0 : index
    %25 = vector.load %arg6[%c0_14, %c0_15] : memref<16x128xf32, #tpu.memory_space<vmem>>, vector<16x128xf32>
    tpu.vector_store %arg6[%c0_14, %c0_15], %24 {strides = array<i32>} : memref<16x128xf32, #tpu.memory_space<vmem>>, vector<16x128xf32>,
    return
  }
  func.func @transform_0(%arg0: i32) -> (i32, i32) {
    %c0_i32 = arith.constant 0 : i32
    %c0_i32_0 = arith.constant 0 : i32
    return %arg0, %c0_i32 : i32, i32
  }
  func.func @transform_1(%arg0: i32) -> (i32, i32) {
    %c0_i32 = arith.constant 0 : i32
    %c0_i32_0 = arith.constant 0 : i32
    %c0_i32_1 = arith.constant 0 : i32
    return %c0_i32, %c0_i32_0 : i32, i32
  }
  func.func @transform_2(%arg0: i32) -> (i32, i32) {
    %c0_i32 = arith.constant 0 : i32
    %c0_i32_0 = arith.constant 0 : i32
    %c0_i32_1 = arith.constant 0 : i32
    return %c0_i32, %c0_i32_0 : i32, i32
  }
  func.func @transform_3(%arg0: i32) -> (i32, i32) {
    %c0_i32 = arith.constant 0 : i32
    %c0_i32_0 = arith.constant 0 : i32
    %c0_i32_1 = arith.constant 0 : i32
    return %c0_i32, %c0_i32_0 : i32, i32
  }
  func.func @transform_4(%arg0: i32) -> (i32, i32) {
    %c0_i32 = arith.constant 0 : i32
    %c0_i32_0 = arith.constant 0 : i32
    %c0_i32_1 = arith.constant 0 : i32
    return %c0_i32, %c0_i32_0 : i32, i32
  }
  func.func @transform_5(%arg0: i32) -> (i32, i32) {
    %c0_i32 = arith.constant 0 : i32
    %c0_i32_0 = arith.constant 0 : i32
    return %arg0, %c0_i32 : i32, i32
  }
}

</mosaic_0001>

<bundles_post_ra>
// kernel: tpu_custom_call.1
= control target key start
LH: loop header
LB: loop body
LE: loop exit
PB: predicated region body
PF: predicated region fallthrough
CT: control target
= control target key end

     0   :  { %10 = vsyncpa [#allocation3], 0  ;;  %s646_s0 = inlined_call_operand.hbm [shape: bf16[16,128], index: 0, kind: input, shape index: {}]   ;;  %s647_s1 = inlined_call_operand.hbm [shape: bf16[128,128], index: 1, kind: input, shape index: {}]   ;;  %s648_s2 = inlined_call_operand.vmem [shape: f32[1,128], index: 2, kind: input, shape index: {}]   ;;  %s649_s3 = inlined_call_operand.hbm [shape: bf16[128,128], index: 3, kind: input, shape index: {}]   ;;  %s650_s4 = inlined_call_operand.vmem [shape: f32[1,128], index: 4, kind: input, shape index: {}]   ;;  %s651_s5 = inlined_call_operand.hbm [shape: f32[16,128], index: 5, kind: output, shape index: {}]  }
   0x1   :  { %11 = vsyncpa [#allocation6], 0 }
   0x2   :  { %12 = vsyncpa [#allocation4], 0  ;;  %s536_s18 = smov [#allocation5]   ;;  %s537_s20 = smov [#allocation2]  }
   0x3   :  { %s30_s19 = sshll.u32 %s536_s18, 4  ;;  %s18_s21 = sshll.u32 %s537_s20, 4  ;;  %s31_s19 = int_to_ptr.vmem [resolvable:$true] %s30_s19  ;;  %s576_s21 = int_to_ptr.vmem [resolvable:$true] %s18_s21 }
   0x4   :  { %s442_s24 = scalar_lea.hbm %s647_s1, 1024 }
   0x5   :  { %p443_p0 = scmp.ne.s32.totalorder %s647_s1, %s442_s24  ;;  %p446_p1 = scmp.lt.u32.totalorder %s442_s24, %s647_s1 }
   0x7   :  { %p448_p2 = pnand %p446_p1, %p443_p0 }
   0x9   :  { %451 = shalt.err (!%p448_p2)
}
   0xa   :  { %s452_s29 = scalar_lea.vmem %s31_s19, 1024  ;;  %p457_p4 = scmp.lt.s32.totalorder %s31_s19, %s31_s19 }
   0xb   :  { %p453_p3 = scmp.ne.s32.totalorder %s31_s19, %s452_s29  ;;  %p458_p5 = scmp.lt.s32.totalorder %s452_s29, %s452_s29 }
   0xd   :  { %p459_p6 = por %p458_p5, %p457_p4 }
   0xf   :  { %p460_p7 = pnand %p459_p6, %p453_p3 }
  0x11   :  { %463 = shalt.err (!%p460_p7)
}
  0x12   :  { %s538_s30 = smov 64   ;;  %s539_s6 = smov 4  }
  0x13   :  { %36 = dma.hbm_to_vmem [thread:$0]  %s647_s1, 1024, %s31_s19, [#allocation6], %s538_s30, %s538_s30, %s539_s6  }
  0x14   :  { %s464_s11 = scalar_lea.hbm %s646_s0, 128 }
  0x15   :  { %p465_p8 = scmp.ne.s32.totalorder %s646_s0, %s464_s11  ;;  %p468_p9 = scmp.lt.u32.totalorder %s464_s11, %s646_s0 }
  0x17   :  { %p470_p10 = pnand %p468_p9, %p465_p8 }
  0x19   :  { %473 = shalt.err (!%p470_p10)
}
  0x1a   :  { %s474_s16 = scalar_lea.vmem %s576_s21, 128  ;;  %p479_p12 = scmp.lt.s32.totalorder %s576_s21, %s576_s21 }
  0x1b   :  { %p475_p11 = scmp.ne.s32.totalorder %s576_s21, %s474_s16  ;;  %p480_p13 = scmp.lt.s32.totalorder %s474_s16, %s474_s16 }
  0x1d   :  { %p481_p0 = por %p480_p13, %p479_p12 }
  0x1f   :  { %p482_p1 = pnand %p481_p0, %p475_p11 }
  0x21   :  { %485 = shalt.err (!%p482_p1)
}
  0x22   :  { %24 = dma.hbm_to_vmem [thread:$0]  %s646_s0, 128, %s576_s21, [#allocation3], %s538_s30, %s538_s30, %s539_s6  }
  0x23   :  { %s540_s18 = smov [#allocation7]   ;;  %s486_s23 = scalar_lea.hbm %s649_s3, 1024 }
  0x24   :  { %s44_s19 = sshll.u32 %s540_s18, 4  ;;  %p487_p2 = scmp.ne.s32.totalorder %s649_s3, %s486_s23  ;;  %s45_s19 = int_to_ptr.vmem [resolvable:$true] %s44_s19 }
  0x25   :  { %p490_p3 = scmp.lt.u32.totalorder %s486_s23, %s649_s3 }
  0x27   :  { %p492_p4 = pnand %p490_p3, %p487_p2 }
  0x29   :  { %495 = shalt.err (!%p492_p4)
}
  0x2a   :  { %s496_s28 = scalar_lea.vmem %s45_s19, 1024  ;;  %p501_p6 = scmp.lt.s32.totalorder %s45_s19, %s45_s19 }
  0x2b   :  { %p497_p5 = scmp.ne.s32.totalorder %s45_s19, %s496_s28  ;;  %p502_p7 = scmp.lt.s32.totalorder %s496_s28, %s496_s28 }
  0x2d   :  { %p503_p8 = por %p502_p7, %p501_p6 }
  0x2f   :  { %p504_p9 = pnand %p503_p8, %p497_p5 }
  0x31   :  { %507 = shalt.err (!%p504_p9)
}
  0x32   :  { %50 = dma.hbm_to_vmem [thread:$0]  %s649_s3, 1024, %s45_s19, [#allocation6], %s538_s30, %s538_s30, %s539_s6  }
  0x33   :  { %530 = dma.done.wait [#allocation3], 128  }
  0x34   :  { %531 = vsyncadd [#allocation3], 4294967168 }
  0x35   :  { %532 = dma.done.wait [#allocation6], 2048  }
  0x36   :  { %533 = vsyncadd [#allocation6], 4294965248  ;;  %v541_v0 = vmov 0.0   ;;  %vm542_vm0 = vmmov 0   ;;  %v421_v1 = vld [vmem:[#allocation5] sm:$0xff]   ;;  %v422_v2 = vld [vmem:[#allocation5 + $0x8] sm:$0xff]  }
  0x37   :  { %371 = vmatprep.subr.bf16.mxu0 %v541_v0  ;;  %387 = vmatprep.mubr.msk.bf16.mxu0 %vm542_vm0, %v541_v0  ;;  %v423_v3 = vld [vmem:[#allocation5 + $0x10] sm:$0xff]   ;;  %v424_v4 = vld [vmem:[#allocation5 + $0x18] sm:$0xff]   ;;  %v425_v5 = vld [vmem:[#allocation5 + $0x20] sm:$0xff]   ;;  %s543_s6 = smov [#allocation8]  }
  0x38   :  { %391 = vmatprep.subr.bf16.mxu1 %v541_v0  ;;  %407 = vmatprep.mubr.msk.bf16.mxu1 %vm542_vm0, %v541_v0  ;;  %v426_v6 = vld [vmem:[#allocation5 + $0x28] sm:$0xff]   ;;  %v427_v7 = vld [vmem:[#allocation5 + $0x30] sm:$0xff]   ;;  %v428_v8 = vld [vmem:[#allocation5 + $0x38] sm:$0xff]   ;;  %s321_s7 = sshll.u32 %s543_s6, 4  ;;  %s322_s7 = int_to_ptr.vmem [resolvable:$true] %s321_s7 }
  0x39   :  { %372 = vmatpush3.bf16.msra.mxu0 %v421_v1  ;;  %v429_v9 = vld [vmem:[#allocation2] sm:$0xff]   ;;  %v430_v10 = vld [vmem:[#allocation7] sm:$0xff]   ;;  %v431_v11 = vld [vmem:[#allocation7 + $0x8] sm:$0xff]   ;;  %s508_s8 = scalar_lea.vmem %s322_s7, 256  ;;  %p513_p11 = scmp.lt.s32.totalorder %s322_s7, %s322_s7 }
  0x3a   :  { %373 = vmatprep.subr.bf16.mxu0 %v541_v0  ;;  %392 = vmatpush3.bf16.msra.mxu1 %v430_v10  ;;  %v432_v12 = vld [vmem:[#allocation7 + $0x10] sm:$0xff]   ;;  %v433_v13 = vld [vmem:[#allocation7 + $0x18] sm:$0xff]   ;;  %v434_v14 = vld [vmem:[#allocation7 + $0x20] sm:$0xff]   ;;  %p509_p10 = scmp.ne.s32.totalorder %s322_s7, %s508_s8  ;;  %p514_p12 = scmp.lt.s32.totalorder %s508_s8, %s508_s8 }
  0x3b   :  { %393 = vmatprep.subr.bf16.mxu1 %v541_v0  ;;  %v435_v15 = vld [vmem:[#allocation7 + $0x28] sm:$0xff]   ;;  %v436_v16 = vld [vmem:[#allocation7 + $0x30] sm:$0xff]   ;;  %v437_v17 = vld [vmem:[#allocation7 + $0x38] sm:$0xff]  }
  0x3c   :  { %v334_v18 = vld [vmem:[%s648_s2] ss:$0 sm:$0xff]  ;;  %p515_p13 = por %p514_p12, %p513_p11 }
  0x3d   :  { %374 = vmatpush3.bf16.msra.mxu0 %v422_v2  ;;  %v344_v44 = vld [vmem:[%s650_s4] ss:$0 sm:$0xff] }
  0x3e   :  { %375 = vmatprep.subr.bf16.mxu0 %v541_v0  ;;  %394 = vmatpush3.bf16.msra.mxu1 %v431_v11  ;;  %p516_p0 = pnand %p515_p13, %p509_p10 }
  0x3f   :  { %395 = vmatprep.subr.bf16.mxu1 %v541_v0 }
  0x41   :  { %376 = vmatpush3.bf16.msra.mxu0 %v423_v3 }
  0x42   :  { %377 = vmatprep.subr.bf16.mxu0 %v541_v0  ;;  %396 = vmatpush3.bf16.msra.mxu1 %v432_v12 }
  0x43   :  { %397 = vmatprep.subr.bf16.mxu1 %v541_v0 }
  0x45   :  { %378 = vmatpush3.bf16.msra.mxu0 %v424_v4 }
  0x46   :  { %379 = vmatprep.subr.bf16.mxu0 %v541_v0  ;;  %398 = vmatpush3.bf16.msra.mxu1 %v433_v13 }
  0x47   :  { %399 = vmatprep.subr.bf16.mxu1 %v541_v0 }
  0x49   :  { %380 = vmatpush3.bf16.msra.mxu0 %v425_v5 }
  0x4a   :  { %381 = vmatprep.subr.bf16.mxu0 %v541_v0  ;;  %400 = vmatpush3.bf16.msra.mxu1 %v434_v14 }
  0x4b   :  { %401 = vmatprep.subr.bf16.mxu1 %v541_v0 }
  0x4d   :  { %382 = vmatpush3.bf16.msra.mxu0 %v426_v6 }
  0x4e   :  { %383 = vmatprep.subr.bf16.mxu0 %v541_v0  ;;  %402 = vmatpush3.bf16.msra.mxu1 %v435_v15 }
  0x4f   :  { %403 = vmatprep.subr.bf16.mxu1 %v541_v0 }
  0x51   :  { %384 = vmatpush3.bf16.msra.mxu0 %v427_v7 }
  0x52   :  { %385 = vmatprep.subr.bf16.mxu0 %v541_v0  ;;  %404 = vmatpush3.bf16.msra.mxu1 %v436_v16 }
  0x53   :  { %405 = vmatprep.subr.bf16.mxu1 %v541_v0 }
  0x55   :  { %386 = vmatpush3.bf16.msra.mxu0 %v428_v8 }
  0x56   :  { %406 = vmatpush3.bf16.msra.mxu1 %v437_v17 }
  0x58   :  { %388 = vmatmul.mubr.bf16.vlgmr.msra.gmra.mrb[0].mxu0 %v429_v9 }
 0x12b   :  { %v176_v19 = vpop.f32.mrb[0].mxu0 }
 0x12c   :  { %v177_v20 = vadd.f32 %v334_v18, %v176_v19  ;;  %v389_v21 = vpop.f32.mrb[1].mxu0 }
 0x12d   :  { %v179_v22 = vpop.f32.mrb[2].mxu0 }
 0x12e   :  { %v183_v23 = vmul.f32 %v177_v20, %v177_v20  ;;  %v180_v24 = vadd.f32 %v334_v18, %v179_v22  ;;  %v390_v25 = vpop.f32.mrb[3].mxu0 }
 0x130   :  { %v185_v26 = vmul.f32 %v183_v23, %v177_v20  ;;  %v184_v27 = vmul.f32 %v180_v24, %v180_v24 }
 0x132   :  { %v187_v28 = vmul.f32 0.044715, %v185_v26  ;;  %v186_v29 = vmul.f32 %v184_v27, %v180_v24 }
 0x134   :  { %v189_v30 = vadd.f32 %v187_v28, %v177_v20  ;;  %v188_v31 = vmul.f32 0.044715, %v186_v29 }
 0x136   :  { %v191_v32 = vmul.f32 0.7978846, %v189_v30  ;;  %v190_v33 = vadd.f32 %v188_v31, %v180_v24 }
 0x138   :  { %438 = vtanh.f32 %v191_v32  ;;  %v192_v34 = vmul.f32 0.7978846, %v190_v33 }
 0x13a   :  { %440 = vtanh.f32 %v192_v34 }
 0x142   :  { %v439_v35 = vpop.eup %438 }
 0x143   :  { %v195_v36 = vadd.f32 1.0, %v439_v35 }
 0x144   :  { %v441_v37 = vpop.eup %440 }
 0x145   :  { %v196_v38 = vadd.f32 1.0, %v441_v37  ;;  %v197_v39 = vmul.f32 0.5, %v195_v36 }
 0x147   :  { %v198_v40 = vmul.f32 0.5, %v196_v38  ;;  %v199_v41 = vmul.f32 %v197_v39, %v177_v20 }
 0x149   :  { %v200_v42 = vmul.f32 %v198_v40, %v180_v24 }
 0x14b   :  { %v201_v43 = vpack.c.bf16 %v200_v42, %v199_v41 }
 0x14d   :  { %408 = vmatmul.mubr.bf16.vlgmr.msra.gmra.mrb[0].mxu1 %v201_v43 }
 0x220   :  { %v307_v45 = vpop.f32.mrb[0].mxu1 }
 0x221   :  { %v308_v46 = vadd.f32 %v344_v44, %v307_v45  ;;  %v409_v47 = vpop.f32.mrb[1].mxu1 }
 0x222   :  { %v310_v48 = vpop.f32.mrb[2].mxu1 }
 0x223   :  { %314 = vst [vmem:[#allocation8] sm:$0xff] %v308_v46  ;;  %v311_v49 = vadd.f32 %v344_v44, %v310_v48  ;;  %v410_v50 = vpop.f32.mrb[3].mxu1 }
 0x225   :  { %315 = vst [vmem:[#allocation8 + $0x8] sm:$0xff] %v311_v49 }
 0x226   :  { %519 = shalt.err (!%p516_p0)
}
 0x227   :  { %s520_s10 = scalar_lea.hbm %s651_s5, 256 }
 0x228   :  { %p521_p1 = scmp.ne.s32.totalorder %s651_s5, %s520_s10  ;;  %p524_p2 = scmp.lt.u32.totalorder %s520_s10, %s651_s5 }
 0x22a   :  { %p526_p3 = pnand %p524_p2, %p521_p1 }
 0x22c   :  { %529 = shalt.err (!%p526_p3)
}
 0x22d   :  { %s544_s15 = smov 128   ;;  %s545_s16 = smov 8  }
 0x22e   :  { %327 = dma.vmem_to_hbm [thread:$0]  %s322_s7, 256, %s651_s5, [#allocation4], %s544_s15, %s544_s15, %s545_s16  }
 0x22f   :  { %534 = dma.done.wait [#allocation4], 256  }
 0x230   :  { %535 = vsyncadd [#allocation4], 4294967040 }
 0x231   :  { %331 = vsyncpa [#allocation3], 1 }
 0x232   :  { %332 = vsyncpa [#allocation6], 1 }
 0x233   :  { %333 = vsyncpa [#allocation4], 1 }

</bundles_post_ra>
